<compile_context>
chip_gen: v7x
topology: tpu7x:2x2x1
jax: 0.10.0
libtpu: 0.0.40
codegen_flags: <defaults>
</compile_context>

<pallas_src>
import jax
import jax.numpy as jnp
from jax import lax
from jax.experimental import pallas as pl
from jax.experimental.pallas import tpu as pltpu

INPUT_DIM = 5
HIDDEN_DIM = 32
OUTPUT_DIM = 2

LANE = 128           # batch-tile granularity (batch sits on the lane axis)
MAX_TILE_B = 16384   # cap: x block [tile_b, 5] is lane-padded to 128 in VMEM
                     # (tile_b * 512 B, double buffered) + [32, tile_b] temps
                     # -> ~25 MiB peak, safe on every generation incl. v7x.
TARGET_STEPS = 4     # aim for >= 4 grid steps: DMA/compute overlap + both
                     # v7x TensorCores split the batch axis.

# Contract the last dim of both operands (flash-attention "NT" dim numbers):
#   dot_general(A[m, k], B[n, k]) -> [m, n]
_NT_DIMS = (((1,), (1,)), ((), ()))


def _policy_kernel(x_ref, w1T_ref, b1_ref, w2T_ref, b2_ref, w3T_ref, b3_ref,
                   oT_ref):
    """out^T = sigmoid(W3ᵀ relu(W2ᵀ relu(W1ᵀ xᵀ + b1) + b2) + b3) for one tile."""
    # Layer 1: Linear + ReLU.  NT matmul contracts the 5-feature axis of
    # W1ᵀ [32, 5] and x [tile_b, 5] -> h1ᵀ [32, tile_b] (batch on lanes), so
    # the transpose is absorbed by the MXU instead of a wrapper HLO pass.
    h1 = lax.dot_general(w1T_ref[...], x_ref[...], _NT_DIMS,
                         preferred_element_type=jnp.float32,
                         precision=lax.Precision.HIGHEST)
    h1 = jnp.maximum(h1 + b1_ref[...], 0.0)                     # [32, tile_b]
    # Layer 2: Linear + ReLU.
    h2 = jnp.dot(w2T_ref[...], h1, preferred_element_type=jnp.float32,
                 precision=lax.Precision.HIGHEST)
    h2 = jnp.maximum(h2 + b2_ref[...], 0.0)                     # [32, tile_b]
    # Layer 3: Linear + Sigmoid (exp runs on the EUP slot -> effectively free).
    h3 = jnp.dot(w3T_ref[...], h2, preferred_element_type=jnp.float32,
                 precision=lax.Precision.HIGHEST)
    z = h3 + b3_ref[...]                                        # [2, tile_b]
    oT_ref[...] = 1.0 / (1.0 + jnp.exp(-z))


def prepare_params(params):
    """Transpose parameters ONCE (hoisted out of the per-step forward).

    No sublane/lane padding: full-extent dims < 8 / < 128 are legal block
    shapes, and un-padded HBM I/O is what this memory-bound kernel pays for.
    """
    (w1, b1), (w2, b2), (w3, b3) = params
    # TODO(synk): optionally cast weights/activations to bf16 for another ~2x
    # HBM-traffic cut; kept f32 so outputs match the f32 reference tightly.
    return (w1.T, b1[:, None], w2.T, b2[:, None], w3.T, b3[:, None])


@jax.jit
def policy_forward(x, prepared):
    """x: [B, INPUT_DIM] float32  ->  [B, OUTPUT_DIM] float32."""
    w1T, b1, w2T, b2, w3T, b3 = prepared
    B = x.shape[0]

    # Batch tiling (all trace-time Python): small B -> one full-extent block;
    # otherwise multiples of 128, targeting >= TARGET_STEPS grid steps and
    # capped at MAX_TILE_B.  Partial trailing blocks are handled by Pallas
    # (garbage rows only affect their own masked-off output columns).
    if B < LANE:
        tile_b = B
    else:
        blocks = pl.cdiv(B, LANE)
        tile_blocks = min(MAX_TILE_B // LANE,
                          max(1, pl.cdiv(blocks, TARGET_STEPS)))
        tile_b = tile_blocks * LANE
    grid = (pl.cdiv(B, tile_b),)

    const = lambda i: (0, 0)  # weights/biases: same (resident) block each step
    outT = pl.pallas_call(
        _policy_kernel,
        out_shape=jax.ShapeDtypeStruct((OUTPUT_DIM, B), jnp.float32),
        grid=grid,
        in_specs=[
            pl.BlockSpec((tile_b, INPUT_DIM), lambda i: (i, 0)),   # x tile
            pl.BlockSpec((HIDDEN_DIM, INPUT_DIM), const),          # W1^T
            pl.BlockSpec((HIDDEN_DIM, 1), const),                  # b1
            pl.BlockSpec((HIDDEN_DIM, HIDDEN_DIM), const),         # W2^T
            pl.BlockSpec((HIDDEN_DIM, 1), const),                  # b2
            pl.BlockSpec((OUTPUT_DIM, HIDDEN_DIM), const),         # W3^T
            pl.BlockSpec((OUTPUT_DIM, 1), const),                  # b3
        ],
        out_specs=pl.BlockSpec((OUTPUT_DIM, tile_b), lambda i: (0, i)),
        compiler_params=pltpu.CompilerParams(
            dimension_semantics=("parallel",),    # both v7x TCs split batch
            vmem_limit_bytes=48 * 1024 * 1024,    # > v5e's 16 MiB default
        ),
    )(x, w1T, b1, w2T, b2, w3T, b3)

    # [OUTPUT_DIM, B] -> [B, OUTPUT_DIM] to match the nn.Module contract.
    # TODO(synk): if the consumer accepts the lane-dense [2, B] layout, return
    # outT directly and drop this small transpose pass.
    return outT.T


def init_params(key):
    """Deterministic synthetic parameters with the nn.Module's shapes."""
    ks = jax.random.split(key, 6)

    def lin(kw, kb, fan_in, fan_out):
        bound = 1.0 / jnp.sqrt(fan_in)
        w = jax.random.uniform(kw, (fan_in, fan_out), jnp.float32, -bound, bound)
        b = jax.random.uniform(kb, (fan_out,), jnp.float32, -bound, bound)
        return w, b

    return (
        lin(ks[0], ks[1], INPUT_DIM, HIDDEN_DIM),
        lin(ks[2], ks[3], HIDDEN_DIM, HIDDEN_DIM),
        lin(ks[4], ks[5], HIDDEN_DIM, OUTPUT_DIM),
    )


def _reference(x, params):
    (w1, b1), (w2, b2), (w3, b3) = params
    h = jnp.maximum(x @ w1 + b1, 0.0)
    h = jnp.maximum(h @ w2 + b2, 0.0)
    return jax.nn.sigmoid(h @ w3 + b3)


if __name__ == "__main__":
    key = jax.random.PRNGKey(0)
    pkey, xkey1, xkey2 = jax.random.split(key, 3)
    params = init_params(pkey)
    prepared = prepare_params(params)          # transpose weights once

    # Small case (single full-extent block, grid=(1,)).
    x_small = jax.random.normal(xkey1, (4, INPUT_DIM), dtype=jnp.float32)
    y_small = policy_forward(x_small, prepared)
    jax.block_until_ready(y_small)
    assert y_small.shape == (4, OUTPUT_DIM)
    assert jnp.allclose(y_small, _reference(x_small, params), atol=2e-5, rtol=2e-5)

    # Multi-step case (grid=3, last block partial) to exercise the tiled path.
    x_big = jax.random.normal(xkey2, (640, INPUT_DIM), dtype=jnp.float32)
    y_big = policy_forward(x_big, prepared)
    jax.block_until_ready(y_big)
    assert y_big.shape == (640, OUTPUT_DIM)
    assert jnp.allclose(y_big, _reference(x_big, params), atol=2e-5, rtol=2e-5)

    print("KERNEL_OK")
</pallas_src>

<mosaic_0001>
module attributes {stable_mosaic.version = 11 : i64} {
  func.func @_policy_kernel(%arg0: i32, %arg1: memref<4x5xf32, #tpu.memory_space<vmem>>, %arg2: memref<32x5xf32, #tpu.memory_space<vmem>>, %arg3: memref<32x1xf32, #tpu.memory_space<vmem>>, %arg4: memref<32x32xf32, #tpu.memory_space<vmem>>, %arg5: memref<32x1xf32, #tpu.memory_space<vmem>>, %arg6: memref<2x32xf32, #tpu.memory_space<vmem>>, %arg7: memref<2x1xf32, #tpu.memory_space<vmem>>, %arg8: memref<2x4xf32, #tpu.memory_space<vmem>>) attributes {dimension_semantics = [#tpu.dimension_semantics<parallel>], iteration_bounds = array<i64: 1>, scalar_prefetch = 0 : i64, scratch_operands = 0 : i64, tpu.core_type = #tpu.core_type<tc>, window_params = [{transform_indices = @transform_0, window_bounds = array<i64: 4, 5>}, {pipeline_mode = #tpu.pipeline_mode<synchronous>, transform_indices = @transform_1, window_bounds = array<i64: 32, 5>}, {pipeline_mode = #tpu.pipeline_mode<synchronous>, transform_indices = @transform_2, window_bounds = array<i64: 32, 1>}, {pipeline_mode = #tpu.pipeline_mode<synchronous>, transform_indices = @transform_3, window_bounds = array<i64: 32, 32>}, {pipeline_mode = #tpu.pipeline_mode<synchronous>, transform_indices = @transform_4, window_bounds = array<i64: 32, 1>}, {pipeline_mode = #tpu.pipeline_mode<synchronous>, transform_indices = @transform_5, window_bounds = array<i64: 2, 32>}, {pipeline_mode = #tpu.pipeline_mode<synchronous>, transform_indices = @transform_6, window_bounds = array<i64: 2, 1>}, {transform_indices = @transform_7, window_bounds = array<i64: 2, 4>}]} {
    %c0 = arith.constant 0 : index
    %c0_0 = arith.constant 0 : index
    %0 = vector.load %arg2[%c0, %c0_0] : memref<32x5xf32, #tpu.memory_space<vmem>>, vector<32x5xf32>
    %c0_1 = arith.constant 0 : index
    %c0_2 = arith.constant 0 : index
    %1 = vector.load %arg1[%c0_1, %c0_2] : memref<4x5xf32, #tpu.memory_space<vmem>>, vector<4x5xf32>
    %cst = arith.constant dense<0.000000e+00> : vector<32x4xf32>
    %2 = tpu.matmul %0, %1, %cst {dimension_numbers = #tpu.dot_dimension_numbers<[1], [1], [0], [0], [0, 0, 1, 0], [], []>, precision = #tpu.contract_precision<fp32>} : vector<32x5xf32>, vector<4x5xf32>, vector<32x4xf32> -> vector<32x4xf32>
    %c0_3 = arith.constant 0 : index
    %c0_4 = arith.constant 0 : index
    %3 = vector.load %arg3[%c0_3, %c0_4] : memref<32x1xf32, #tpu.memory_space<vmem>>, vector<32x1xf32>
    %4 = vector.broadcast %3 : vector<32x1xf32> to vector<32x4xf32>
    %5 = arith.addf %2, %4 : vector<32x4xf32>
    %cst_5 = arith.constant 0.000000e+00 : f32
    %6 = vector.broadcast %cst_5 : f32 to vector<32x4xf32>
    %7 = arith.maximumf %5, %6 : vector<32x4xf32>
    %c0_6 = arith.constant 0 : index
    %c0_7 = arith.constant 0 : index
    %8 = vector.load %arg4[%c0_6, %c0_7] : memref<32x32xf32, #tpu.memory_space<vmem>>, vector<32x32xf32>
    %cst_8 = arith.constant dense<0.000000e+00> : vector<32x4xf32>
    %9 = tpu.matmul %8, %7, %cst_8 {dimension_numbers = #tpu.dot_dimension_numbers<[1], [0], [0], [1], [0, 0, 1, 1], [], []>, precision = #tpu.contract_precision<fp32>} : vector<32x32xf32>, vector<32x4xf32>, vector<32x4xf32> -> vector<32x4xf32>
    %c0_9 = arith.constant 0 : index
    %c0_10 = arith.constant 0 : index
    %10 = vector.load %arg5[%c0_9, %c0_10] : memref<32x1xf32, #tpu.memory_space<vmem>>, vector<32x1xf32>
    %11 = vector.broadcast %10 : vector<32x1xf32> to vector<32x4xf32>
    %12 = arith.addf %9, %11 : vector<32x4xf32>
    %cst_11 = arith.constant 0.000000e+00 : f32
    %13 = vector.broadcast %cst_11 : f32 to vector<32x4xf32>
    %14 = arith.maximumf %12, %13 : vector<32x4xf32>
    %c0_12 = arith.constant 0 : index
    %c0_13 = arith.constant 0 : index
    %15 = vector.load %arg6[%c0_12, %c0_13] : memref<2x32xf32, #tpu.memory_space<vmem>>, vector<2x32xf32>
    %cst_14 = arith.constant dense<0.000000e+00> : vector<2x4xf32>
    %16 = tpu.matmul %15, %14, %cst_14 {dimension_numbers = #tpu.dot_dimension_numbers<[1], [0], [0], [1], [0, 0, 1, 1], [], []>, precision = #tpu.contract_precision<fp32>} : vector<2x32xf32>, vector<32x4xf32>, vector<2x4xf32> -> vector<2x4xf32>
    %c0_15 = arith.constant 0 : index
    %c0_16 = arith.constant 0 : index
    %17 = vector.load %arg7[%c0_15, %c0_16] : memref<2x1xf32, #tpu.memory_space<vmem>>, vector<2x1xf32>
    %18 = vector.broadcast %17 : vector<2x1xf32> to vector<2x4xf32>
    %19 = arith.addf %16, %18 : vector<2x4xf32>
    %cst_17 = arith.constant 0.000000e+00 : f32
    %20 = vector.broadcast %cst_17 : f32 to vector<2x4xf32>
    %21 = arith.subf %20, %19 : vector<2x4xf32>
    %22 = math.exp %21 : vector<2x4xf32>
    %cst_18 = arith.constant 1.000000e+00 : f32
    %23 = vector.broadcast %cst_18 : f32 to vector<2x4xf32>
    %24 = arith.addf %23, %22 : vector<2x4xf32>
    %cst_19 = arith.constant 1.000000e+00 : f32
    %25 = vector.broadcast %cst_19 : f32 to vector<2x4xf32>
    %26 = arith.divf %25, %24 : vector<2x4xf32>
    %c0_20 = arith.constant 0 : index
    %c0_21 = arith.constant 0 : index
    %27 = vector.load %arg8[%c0_20, %c0_21] : memref<2x4xf32, #tpu.memory_space<vmem>>, vector<2x4xf32>
    tpu.vector_store %arg8[%c0_20, %c0_21], %26 {strides = array<i32>} : memref<2x4xf32, #tpu.memory_space<vmem>>, vector<2x4xf32>,
    return
  }
  func.func @transform_0(%arg0: i32) -> (i32, i32) {
    %c0_i32 = arith.constant 0 : i32
    %c0_i32_0 = arith.constant 0 : i32
    return %arg0, %c0_i32 : i32, i32
  }
  func.func @transform_1(%arg0: i32) -> (i32, i32) {
    %c0_i32 = arith.constant 0 : i32
    %c0_i32_0 = arith.constant 0 : i32
    %c0_i32_1 = arith.constant 0 : i32
    return %c0_i32, %c0_i32_0 : i32, i32
  }
  func.func @transform_2(%arg0: i32) -> (i32, i32) {
    %c0_i32 = arith.constant 0 : i32
    %c0_i32_0 = arith.constant 0 : i32
    %c0_i32_1 = arith.constant 0 : i32
    return %c0_i32, %c0_i32_0 : i32, i32
  }
  func.func @transform_3(%arg0: i32) -> (i32, i32) {
    %c0_i32 = arith.constant 0 : i32
    %c0_i32_0 = arith.constant 0 : i32
    %c0_i32_1 = arith.constant 0 : i32
    return %c0_i32, %c0_i32_0 : i32, i32
  }
  func.func @transform_4(%arg0: i32) -> (i32, i32) {
    %c0_i32 = arith.constant 0 : i32
    %c0_i32_0 = arith.constant 0 : i32
    %c0_i32_1 = arith.constant 0 : i32
    return %c0_i32, %c0_i32_0 : i32, i32
  }
  func.func @transform_5(%arg0: i32) -> (i32, i32) {
    %c0_i32 = arith.constant 0 : i32
    %c0_i32_0 = arith.constant 0 : i32
    %c0_i32_1 = arith.constant 0 : i32
    return %c0_i32, %c0_i32_0 : i32, i32
  }
  func.func @transform_6(%arg0: i32) -> (i32, i32) {
    %c0_i32 = arith.constant 0 : i32
    %c0_i32_0 = arith.constant 0 : i32
    %c0_i32_1 = arith.constant 0 : i32
    return %c0_i32, %c0_i32_0 : i32, i32
  }
  func.func @transform_7(%arg0: i32) -> (i32, i32) {
    %c0_i32 = arith.constant 0 : i32
    %c0_i32_0 = arith.constant 0 : i32
    return %c0_i32, %arg0 : i32, i32
  }
}

</mosaic_0001>

<bundles_post_ra>
// kernel: policy_forward.1
= control target key start
LH: loop header
LB: loop body
LE: loop exit
PB: predicated region body
PF: predicated region fallthrough
CT: control target
= control target key end

     0   :  { %vm56_vm0 = vcmask 39936   ;;  %v2310_v8 = vmov 0   ;;  %s2566_s0 = inlined_call_operand.vmem [shape: f32[4,5], index: 0, kind: input, shape index: {}]   ;;  %s2567_s1 = inlined_call_operand.vmem [shape: f32[32,5], index: 1, kind: input, shape index: {}]   ;;  %s2568_s2 = inlined_call_operand.vmem [shape: f32[32,1], index: 2, kind: input, shape index: {}]   ;;  %s2569_s3 = inlined_call_operand.vmem [shape: f32[32,32], index: 3, kind: input, shape index: {}]   ;;  %s2570_s4 = inlined_call_operand.vmem [shape: f32[32,1], index: 4, kind: input, shape index: {}]   ;;  %s2571_s5 = inlined_call_operand.vmem [shape: f32[2,32], index: 5, kind: input, shape index: {}]   ;;  %s2572_s6 = inlined_call_operand.vmem [shape: f32[2,1], index: 6, kind: input, shape index: {}]   ;;  %s2573_s7 = inlined_call_operand.hbm [shape: f32[2,4], index: 7, kind: output, shape index: {}]  }
   0x1   :  { %v31_v0 = vld [vmem:[%s2566_s0] sm:$0xf]  ;;  %v28_v2 = vld [vmem:[%s2567_s1 + $0x8] sm:$0xff]  ;;  %v29_v6 = vld [vmem:[%s2567_s1 + $0x10] sm:$0xff]  ;;  %2280 = vset.pattern.permute.xlu0 %v2310_v8  ;;  %2281 = vset.pattern.permute.xlu1 %v2310_v8 }
   0x2   :  { %v27_v1 = vld [vmem:[%s2567_s1] sm:$0xff]  ;;  %v70_v3 = vsel %vm56_vm0, %v31_v0, 0  ;;  %v61_v5 = vsel %vm56_vm0, %v28_v2, 0  ;;  %v30_v7 = vld [vmem:[%s2567_s1 + $0x18] sm:$0xff]  ;;  %v64_v13 = vsel %vm56_vm0, %v29_v6, 0  ;;  %v34_v14 = vld [vmem:[%s2568_s2 + $0x10] sm:$0xff] }
   0x3   :  { %v58_v4 = vsel %vm56_vm0, %v27_v1, 0  ;;  %v32_v9 = vld [vmem:[%s2568_s2] sm:$0xff]  ;;  %v2376_v10 = vand.u32 4294901760, %v70_v3  ;;  %v2380_v12 = vand.u32 4294901760, %v61_v5  ;;  %v2386_v15 = vand.u32 4294901760, %v64_v13  ;;  %48 = vperm.xlu1 %2281, %v34_v14   ;;  %v33_v21 = vld [vmem:[%s2568_s2 + $0x8] sm:$0xff] }
   0x4   :  { %v2378_v11 = vand.u32 4294901760, %v58_v4  ;;  %38 = vperm.xlu0 %2280, %v32_v9   ;;  %v67_v16 = vsel %vm56_vm0, %v30_v7, 0  ;;  %v35_v23 = vld [vmem:[%s2568_s2 + $0x18] sm:$0xff] }
   0x5   :  { %v180_v17 = vsub.f32 %v70_v3, %v2376_v10  ;;  %v149_v19 = vsub.f32 %v61_v5, %v2380_v12  ;;  %1935 = vmatprep.subr.mxu1 %v2376_v10  ;;  %v2393_v20 = vand.u32 4294901760, %v67_v16  ;;  %v159_v22 = vsub.f32 %v64_v13, %v2386_v15 }
   0x6   :  { %v139_v18 = vsub.f32 %v58_v4, %v2378_v11  ;;  %1936 = vmatpush3.xpose.msra.mxu1 %v2376_v10 }
   0x7   :  { %12 = vsyncpa [#allocation3], 0  ;;  %1951 = vmatprep.subr.mxu0 %v180_v17  ;;  %v169_v25 = vsub.f32 %v67_v16, %v2393_v20  ;;  %v150_v26 = vand.u32 4294901760, %v149_v19  ;;  %v181_v27 = vand.u32 4294901760, %v180_v17  ;;  %v160_v28 = vand.u32 4294901760, %v159_v22  ;;  %53 = vperm.xlu1 %2281, %v35_v23   ;;  %v655_v40 = vld [vmem:[%s2570_s4] sm:$0xff] }
   0x8   :  { %1953 = vmatprep.mubr.f32.mxu0 %v139_v18  ;;  %v140_v24 = vand.u32 4294901760, %v139_v18  ;;  %1952 = vmatpush3.xpose.msra.mxu0 %v180_v17  ;;  %v656_v41 = vld [vmem:[%s2570_s4 + $0x8] sm:$0xff]  ;;  %v657_v42 = vld [vmem:[%s2570_s4 + $0x10] sm:$0xff]  ;;  %v658_v43 = vld [vmem:[%s2570_s4 + $0x18] sm:$0xff]  ;;  %vm679_vm1 = vcmask 261120   ;;  %vm2312_vm2 = vmmov 0  }
   0x9   :  { %43 = vperm.xlu0 %2280, %v33_v21   ;;  %1959 = vmatprep.subr.mxu0 %v2376_v10  ;;  %v151_v30 = vsub.f32 %v149_v19, %v150_v26  ;;  %v170_v31 = vand.u32 4294901760, %v169_v25  ;;  %v182_v32 = vsub.f32 %v180_v17, %v181_v27  ;;  %v161_v33 = vsub.f32 %v159_v22, %v160_v28  ;;  %v1311_v44 = vld [vmem:[%s2572_s6] sm:$0x3]  ;;  %v652_v55 = vld [vmem:[%s2569_s3 + $0x8] sm:$0xff]  ;;  %v653_v58 = vld [vmem:[%s2569_s3 + $0x10] sm:$0xff] }
   0xa   :  { %v141_v29 = vsub.f32 %v139_v18, %v140_v24  ;;  %v651_v45 = vld [vmem:[%s2569_s3] sm:$0xff]  ;;  %v684_v59 = vsel %vm679_vm1, %v652_v55, 0  ;;  %v687_v61 = vsel %vm679_vm1, %v653_v58, 0  ;;  %v654_v62 = vld [vmem:[%s2569_s3 + $0x18] sm:$0xff]  ;;  %vm1811_vm3 = vcmask 25600  }
   0xb   :  { %1954 = vmatmul.mubr.f32.vlgmr.msra.gmra.mrb[0].mxu0 %v149_v19  ;;  %v152_v35 = vand.u32 4294901760, %v151_v30  ;;  %v171_v36 = vsub.f32 %v169_v25, %v170_v31  ;;  %v183_v37 = vand.u32 4294901760, %v182_v32  ;;  %v162_v38 = vand.u32 4294901760, %v161_v33  ;;  %666 = vperm.xlu1 %2281, %v656_v41  }
   0xc   :  { %v142_v34 = vand.u32 4294901760, %v141_v29  ;;  %1960 = vmatpush3.xpose.msra.mxu0 %v2376_v10  ;;  %1956 = vmatprep.mubr.f32.mxu0 %v159_v22  ;;  %v681_v46 = vsel %vm679_vm1, %v651_v45, 0  ;;  %v2459_v63 = vand.u32 4294901760, %v684_v59  ;;  %v2461_v2 = vand.u32 4294901760, %v687_v61 }
   0xd   :  { %1967 = vmatprep.subr.mxu0 %v181_v27  ;;  %v172_v39 = vand.u32 4294901760, %v171_v36  ;;  %1943 = vmatprep.subr.mxu1 %v183_v37  ;;  %v2439_v47 = vand.u32 4294901760, %v681_v46  ;;  %v690_v3 = vsel %vm679_vm1, %v654_v62, 0 }
   0xe   :  { %1937 = vmatprep.mubr.f32.mxu1 %v142_v34  ;;  %661 = vperm.xlu0 %2280, %v655_v40   ;;  %v2465_v8 = vsub.f32 %v684_v59, %v2459_v63  ;;  %v2470_v14 = vsub.f32 %v687_v61, %v2461_v2 }
   0xf   :  { %1938 = vmatmul.mubr.f32.vlgmr.msra.gmra.mrb[0].mxu1 %v152_v35  ;;  %1957 = vmatmul.mubr.f32.gmra.mrb[2].mxu0 %v169_v25  ;;  %v2442_v48 = vsub.f32 %v681_v46, %v2439_v47 }
  0x10   :  { %1940 = vmatprep.mubr.f32.mxu1 %v162_v38  ;;  %1961 = vmatprep.mubr.f32.mxu0 %v140_v24  ;;  %v773_v21 = vand.u32 4294901760, %v2465_v8 }
  0x11   :  { %1944 = vmatpush3.xpose.msra.mxu1 %v183_v37  ;;  %676 = vperm.xlu1 %2281, %v658_v43   ;;  %v763_v49 = vand.u32 4294901760, %v2442_v48 }
  0x12   :  { %671 = vperm.xlu0 %2280, %v657_v42   ;;  %v774_v33 = vsub.f32 %v2465_v8, %v773_v21 }
  0x13   :  { %1941 = vmatmul.mubr.f32.gmra.mrb[2].mxu1 %v172_v39  ;;  %1962 = vmatmul.mubr.f32.vlgmr.msra.gmra.mrb[0].mxu0 %v150_v26  ;;  %v764_v50 = vsub.f32 %v2442_v48, %v763_v49 }
  0x14   :  { %1945 = vmatprep.mubr.f32.mxu1 %v2378_v11  ;;  %1968 = vmatpush3.xpose.msra.mxu0 %v181_v27  ;;  %v783_v27 = vand.u32 4294901760, %v2470_v14  ;;  %v775_v46 = vand.u32 4294901760, %v774_v33 }
  0x15   :  { %1964 = vmatprep.mubr.f32.mxu0 %v160_v28  ;;  %1975 = vmatprep.subr.mxu0 %v2376_v10  ;;  %v765_v51 = vand.u32 4294901760, %v764_v50 }
  0x16   :  { %1314 = vperm.xlu0 %2280, %v1311_v44   ;;  %v784_v40 = vsub.f32 %v2470_v14, %v783_v27 }
  0x17   :  { %1946 = vmatmul.mubr.f32.vlgmr.msra.gmra.mrb[0].mxu1 %v2380_v12  ;;  %1965 = vmatmul.mubr.f32.gmra.mrb[2].mxu0 %v170_v31 }
  0x18   :  { %1948 = vmatprep.mubr.f32.mxu1 %v2386_v15  ;;  %1969 = vmatprep.mubr.f32.mxu0 %v2378_v11  ;;  %v785_v55 = vand.u32 4294901760, %v784_v40 }
  0x1b   :  { %1949 = vmatmul.mubr.f32.gmra.mrb[2].mxu1 %v2393_v20  ;;  %1970 = vmatmul.mubr.f32.vlgmr.msra.gmra.mrb[0].mxu0 %v2380_v12 }
  0x1c   :  { %1976 = vmatpush3.xpose.msra.mxu0 %v2376_v10  ;;  %1972 = vmatprep.mubr.f32.mxu0 %v2386_v15 }
  0x1d   :  { %1991 = vmatprep.mubr.f32.mxu1 %v765_v51 }
  0x1f   :  { %1973 = vmatmul.mubr.f32.gmra.mrb[2].mxu0 %v2393_v20 }
  0x20   :  { %1977 = vmatprep.mubr.f32.mxu0 %v2378_v11  ;;  %v2467_v11 = vand.u32 4294901760, %v690_v3 }
  0x22   :  { %v2474_v24 = vsub.f32 %v690_v3, %v2467_v11 }
  0x23   :  { %1978 = vmatmul.mubr.f32.vlgmr.msra.gmra.mrb[0].mxu0 %v2380_v12 }
  0x24   :  { %1980 = vmatprep.mubr.f32.mxu0 %v2386_v15  ;;  %v793_v36 = vand.u32 4294901760, %v2474_v24 }
  0x27   :  { %1981 = vmatmul.mubr.f32.gmra.mrb[2].mxu0 %v2393_v20 }
  0x82   :  { %v49_v60 = vpop.permute.xlu1 %48 }
  0x83   :  { %v39_v56 = vpop.permute.xlu0 %38 }
  0x86   :  { %v54_v9 = vpop.permute.xlu1 %53 }
  0x88   :  { %v44_v0 = vpop.permute.xlu0 %43 }
  0x8d   :  { %v662_v3 = vpop.permute.xlu0 %661 }
  0xea   :  { %v1947_v52 = vpop.f32.mrb[0].mxu1 }
  0xeb   :  { %v250_v53 = vpop.f32.mrb[1].mxu1  ;;  %v2217_v1 = vadd.f32 %v1947_v52, %v44_v0 }
  0xec   :  { %v2219_v4 = vadd.f32 %v250_v53, %v39_v56  ;;  %v794_v53 = vsub.f32 %v2474_v24, %v793_v36 }
  0xee   :  { %v1950_v54 = vpop.f32.mrb[2].mxu1  ;;  %v795_v61 = vand.u32 4294901760, %v794_v53 }
  0xef   :  { %v262_v57 = vpop.f32.mrb[3].mxu1  ;;  %v2221_v12 = vadd.f32 %v1950_v54, %v54_v9 }
  0xf0   :  { %v2223_v15 = vadd.f32 %v262_v57, %v49_v60 }
  0xf6   :  { %v1979_v5 = vpop.f32.mrb[0].mxu0 }
  0xf7   :  { %v2218_v6 = vadd.f32 %v2217_v1, %v1979_v5  ;;  %v625_v7 = vpop.f32.mrb[1].mxu0 }
  0xf8   :  { %v2220_v10 = vadd.f32 %v2219_v4, %v625_v7 }
  0xf9   :  { %v648_v13 = vmax.f32 %v2218_v6, 0.0 }
  0xfa   :  { %v647_v16 = vmax.f32 %v2220_v10, 0.0  ;;  %v1982_v17 = vpop.f32.mrb[2].mxu0 }
  0xfb   :  { %v696_v18 = vand.u32 4294901760, %v648_v13  ;;  %v2222_v19 = vadd.f32 %v2221_v12, %v1982_v17  ;;  %v637_v20 = vpop.f32.mrb[3].mxu0 }
  0xfc   :  { %v693_v22 = vand.u32 4294901760, %v647_v16  ;;  %v2224_v23 = vadd.f32 %v2223_v15, %v637_v20 }
  0xfd   :  { %v810_v25 = vsub.f32 %v648_v13, %v696_v18  ;;  %v650_v26 = vmax.f32 %v2222_v19, 0.0  ;;  %v672_v13 = vpop.permute.xlu0 %671 }
  0xfe   :  { %v2477_v28 = vpack.c.bf16 %v696_v18, %v693_v22  ;;  %v803_v29 = vsub.f32 %v647_v16, %v693_v22  ;;  %v649_v30 = vmax.f32 %v2224_v23, 0.0 }
  0xff   :  { %v811_v31 = vand.u32 4294901760, %v810_v25  ;;  %v702_v32 = vand.u32 4294901760, %v650_v26 }
 0x100   :  { %v804_v34 = vand.u32 4294901760, %v803_v29  ;;  %v699_v35 = vand.u32 4294901760, %v649_v30  ;;  %2134 = vmatprep.subr.bf16.mxu1 %v2477_v28  ;;  %v2149_v37 = vpack.c.bf16 %v810_v25, %v803_v29 }
 0x101   :  { %v824_v38 = vsub.f32 %v650_v26, %v702_v32  ;;  %2136 = vmatpush3.bf16.msra.mxu1 %v2477_v28  ;;  %v812_v39 = vsub.f32 %v810_v25, %v811_v31 }
 0x102   :  { %v2137_v41 = vpack.c.bf16 %v702_v32, %v699_v35  ;;  %v817_v42 = vsub.f32 %v649_v30, %v699_v35  ;;  %v805_v43 = vsub.f32 %v803_v29, %v804_v34  ;;  %v2165_v44 = vpack.c.bf16 %v811_v31, %v804_v34 }
 0x103   :  { %v825_v45 = vand.u32 4294901760, %v824_v38  ;;  %v813_v50 = vand.u32 4294901760, %v812_v39 }
 0x104   :  { %v818_v51 = vand.u32 4294901760, %v817_v42  ;;  %2138 = vmatprep.subr.bf16.mxu1 %v2137_v41  ;;  %v806_v52 = vand.u32 4294901760, %v805_v43  ;;  %v2153_v54 = vpack.c.bf16 %v824_v38, %v817_v42 }
 0x105   :  { %2140 = vmatpush3.bf16.msra.mxu1 %v2137_v41  ;;  %v826_v56 = vsub.f32 %v824_v38, %v825_v45 }
 0x106   :  { %v2141_v57 = vpack.c.bf16 %v813_v50, %v806_v52  ;;  %v819_v58 = vsub.f32 %v817_v42, %v818_v51  ;;  %v2169_v59 = vpack.c.bf16 %v825_v45, %v818_v51 }
 0x107   :  { %v827_v60 = vand.u32 4294901760, %v826_v56 }
 0x108   :  { %1992 = vmatmul.mubr.f32.vlgmr.msra.gmra.mrb[4].mxu1 %v775_v46  ;;  %2142 = vmatprep.subr.bf16.mxu1 %v2141_v57  ;;  %v820_v62 = vand.u32 4294901760, %v819_v58 }
 0x109   :  { %2144 = vmatpush3.bf16.msra.mxu1 %v2141_v57  ;;  %1994 = vmatprep.mubr.f32.mxu1 %v785_v55  ;;  %v1315_v55 = vpop.permute.xlu0 %1314 }
 0x10a   :  { %v2145_v0 = vpack.c.bf16 %v827_v60, %v820_v62 }
 0x10c   :  { %1995 = vmatmul.mubr.f32.gmra.mrb[6].mxu1 %v795_v61  ;;  %2146 = vmatprep.subr.bf16.mxu1 %v2145_v0 }
 0x10d   :  { %2148 = vmatpush3.bf16.msra.mxu1 %v2145_v0  ;;  %2005 = vmatprep.mubr.f32.mxu1 %v2439_v47 }
 0x10e   :  { %2150 = vmatprep.subr.bf16.mxu1 %v2149_v37 }
 0x110   :  { %2006 = vmatmul.mubr.f32.vlgmr.msra.gmra.mrb[4].mxu1 %v2459_v63 }
 0x111   :  { %2152 = vmatpush3.bf16.msra.mxu1 %v2149_v37  ;;  %2008 = vmatprep.mubr.f32.mxu1 %v2461_v2 }
 0x112   :  { %2154 = vmatprep.subr.bf16.mxu1 %v2153_v54 }
 0x114   :  { %2009 = vmatmul.mubr.f32.gmra.mrb[6].mxu1 %v2467_v11 }
 0x115   :  { %2156 = vmatpush3.bf16.msra.mxu1 %v2153_v54  ;;  %2019 = vmatprep.mubr.f32.mxu1 %v2442_v48  ;;  %v2311_v48 = vmov 0.0|0.0  }
 0x116   :  { %2158 = vmatprep.subr.bf16.mxu1 %v2477_v28  ;;  %2187 = vmatprep.subr.bf16.mxu0 %v2311_v48 }
 0x118   :  { %2020 = vmatmul.mubr.f32.vlgmr.msra.gmra.mrb[4].mxu1 %v2465_v8 }
 0x119   :  { %2160 = vmatpush3.bf16.msra.mxu1 %v2477_v28  ;;  %2022 = vmatprep.mubr.f32.mxu1 %v2470_v14 }
 0x11a   :  { %2162 = vmatprep.subr.bf16.mxu1 %v2137_v41 }
 0x11c   :  { %2023 = vmatmul.mubr.f32.gmra.mrb[6].mxu1 %v2474_v24 }
 0x11d   :  { %2164 = vmatpush3.bf16.msra.mxu1 %v2137_v41  ;;  %2033 = vmatprep.mubr.f32.mxu1 %v763_v49  ;;  %v2313_v49 = vmov 0.0  }
 0x11e   :  { %2166 = vmatprep.subr.bf16.mxu1 %v2165_v44  ;;  %2086 = vmatprep.mubr.msk.f32.mxu0 %vm2312_vm2, %v2313_v49 }
 0x120   :  { %2034 = vmatmul.mubr.f32.vlgmr.msra.gmra.mrb[4].mxu1 %v773_v21 }
 0x121   :  { %2168 = vmatpush3.bf16.msra.mxu1 %v2165_v44  ;;  %2036 = vmatprep.mubr.f32.mxu1 %v783_v27 }
 0x122   :  { %2170 = vmatprep.subr.bf16.mxu1 %v2169_v59 }
 0x124   :  { %2037 = vmatmul.mubr.f32.gmra.mrb[6].mxu1 %v793_v36 }
 0x125   :  { %2172 = vmatpush3.bf16.msra.mxu1 %v2169_v59  ;;  %2047 = vmatprep.mubr.f32.mxu1 %v2439_v47 }
 0x126   :  { %2174 = vmatprep.subr.bf16.mxu1 %v2477_v28 }
 0x128   :  { %2048 = vmatmul.mubr.f32.vlgmr.msra.gmra.mrb[4].mxu1 %v2459_v63 }
 0x129   :  { %2176 = vmatpush3.bf16.msra.mxu1 %v2477_v28  ;;  %2050 = vmatprep.mubr.f32.mxu1 %v2461_v2 }
 0x12a   :  { %2178 = vmatprep.subr.bf16.mxu1 %v2137_v41 }
 0x12c   :  { %2051 = vmatmul.mubr.f32.gmra.mrb[6].mxu1 %v2467_v11 }
 0x12d   :  { %2180 = vmatpush3.bf16.msra.mxu1 %v2137_v41  ;;  %2061 = vmatprep.mubr.f32.mxu1 %v2439_v47  ;;  %v1310_v47 = vld [vmem:[%s2571_s5] sm:$0x3]  ;;  %s2314_s5 = smov [#allocation2]  }
 0x12e   :  { %2181 = vmatprep.subr.bf16.mxu1 %v2311_v48  ;;  %s1819_s9 = sshll.u32 %s2314_s5, 4  ;;  %s1820_s9 = int_to_ptr.vmem [resolvable:$true] %s1819_s9 }
 0x12f   :  { %s2286_s10 = scalar_lea.vmem %s1820_s9, 32  ;;  %p2291_p1 = scmp.lt.s32.totalorder %s1820_s9, %s1820_s9 }
 0x130   :  { %2062 = vmatmul.mubr.f32.vlgmr.msra.gmra.mrb[4].mxu1 %v2459_v63  ;;  %v1318_v63 = vsel %vm679_vm1, %v1310_v47, 0  ;;  %p2287_p0 = scmp.ne.s32.totalorder %s1820_s9, %s2286_s10  ;;  %p2292_p2 = scmp.lt.s32.totalorder %s2286_s10, %s2286_s10 }
 0x131   :  { %2064 = vmatprep.mubr.f32.mxu1 %v2461_v2  ;;  %v2525_v1 = vand.u32 4294901760, %v1318_v63  ;;  %v667_v2 = vpop.permute.xlu1 %666 }
 0x132   :  { %p2293_p3 = por %p2292_p2, %p2291_p1 }
 0x133   :  { %v2528_v7 = vsub.f32 %v1318_v63, %v2525_v1 }
 0x134   :  { %2065 = vmatmul.mubr.f32.gmra.mrb[6].mxu1 %v2467_v11  ;;  %p2294_p4 = pnand %p2293_p3, %p2287_p0 }
 0x135   :  { %2075 = vmatprep.mubr.msk.f32.mxu1 %vm2312_vm2, %v2313_v49  ;;  %v677_v10 = vpop.permute.xlu1 %676  ;;  %v1391_v17 = vand.u32 4294901760, %v2528_v7 }
 0x137   :  { %v1392_v27 = vsub.f32 %v2528_v7, %v1391_v17 }
 0x139   :  { %v1393_v39 = vand.u32 4294901760, %v1392_v27 }
 0x203   :  { %v2063_v4 = vpop.f32.mrb[4].mxu1 }
 0x204   :  { %v2225_v5 = vadd.f32 %v2063_v4, %v667_v2  ;;  %v1284_v6 = vpop.f32.mrb[5].mxu1 }
 0x205   :  { %v2226_v8 = vadd.f32 %v1284_v6, %v662_v3 }
 0x206   :  { %v1307_v9 = vmax.f32 %v2225_v5, 0.0 }
 0x207   :  { %v1306_v11 = vmax.f32 %v2226_v8, 0.0  ;;  %v2066_v12 = vpop.f32.mrb[6].mxu1 }
 0x208   :  { %v1324_v14 = vand.u32 4294901760, %v1307_v9  ;;  %v2227_v15 = vadd.f32 %v2066_v12, %v677_v10  ;;  %v1296_v16 = vpop.f32.mrb[7].mxu1 }
 0x209   :  { %v1321_v18 = vand.u32 4294901760, %v1306_v11  ;;  %v2228_v19 = vadd.f32 %v1296_v16, %v672_v13 }
 0x20a   :  { %v1408_v20 = vsub.f32 %v1307_v9, %v1324_v14  ;;  %v1309_v21 = vmax.f32 %v2227_v15, 0.0 }
 0x20b   :  { %v2182_v22 = vpack.c.bf16 %v1324_v14, %v1321_v18  ;;  %v1401_v23 = vsub.f32 %v1306_v11, %v1321_v18  ;;  %v1308_v24 = vmax.f32 %v2228_v19, 0.0 }
 0x20c   :  { %v1409_v25 = vand.u32 4294901760, %v1408_v20  ;;  %v1330_v26 = vand.u32 4294901760, %v1309_v21 }
 0x20d   :  { %v1402_v28 = vand.u32 4294901760, %v1401_v23  ;;  %v1327_v29 = vand.u32 4294901760, %v1308_v24  ;;  %2183 = vmatpush3.bf16.msra.mxu1 %v2182_v22  ;;  %v2194_v30 = vpack.c.bf16 %v1408_v20, %v1401_v23 }
 0x20e   :  { %v1410_v31 = vsub.f32 %v1408_v20, %v1409_v25  ;;  %v1422_v32 = vsub.f32 %v1309_v21, %v1330_v26  ;;  %2184 = vmatprep.subr.bf16.mxu1 %v2311_v48 }
 0x20f   :  { %v1403_v33 = vsub.f32 %v1401_v23, %v1402_v28  ;;  %v2185_v34 = vpack.c.bf16 %v1330_v26, %v1327_v29  ;;  %v1415_v35 = vsub.f32 %v1308_v24, %v1327_v29  ;;  %v2206_v36 = vpack.c.bf16 %v1409_v25, %v1402_v28 }
 0x210   :  { %v1411_v37 = vand.u32 4294901760, %v1410_v31  ;;  %v1423_v38 = vand.u32 4294901760, %v1422_v32 }
 0x211   :  { %v1404_v40 = vand.u32 4294901760, %v1403_v33  ;;  %v1416_v41 = vand.u32 4294901760, %v1415_v35  ;;  %2186 = vmatpush3.bf16.msra.mxu1 %v2185_v34  ;;  %v2197_v42 = vpack.c.bf16 %v1422_v32, %v1415_v35 }
 0x212   :  { %v1424_v43 = vsub.f32 %v1422_v32, %v1423_v38 }
 0x213   :  { %v1417_v44 = vsub.f32 %v1415_v35, %v1416_v41  ;;  %v2188_v45 = vpack.c.bf16 %v1411_v37, %v1404_v40  ;;  %v2209_v46 = vpack.c.bf16 %v1423_v38, %v1416_v41 }
 0x214   :  { %v1425_v50 = vand.u32 4294901760, %v1424_v43  ;;  %2076 = vmatmul.mubr.f32.vlgmr.msra.gmra.mrb[8].mxu1 %v1393_v39 }
 0x215   :  { %v1418_v51 = vand.u32 4294901760, %v1417_v44  ;;  %2189 = vmatpush3.bf16.msra.mxu0 %v2188_v45 }
 0x216   :  { %2190 = vmatprep.subr.bf16.mxu0 %v2311_v48 }
 0x217   :  { %v2191_v52 = vpack.c.bf16 %v1425_v50, %v1418_v51 }
 0x219   :  { %2192 = vmatpush3.bf16.msra.mxu0 %v2191_v52 }
 0x21a   :  { %2193 = vmatprep.subr.bf16.mxu0 %v2311_v48 }
 0x21c   :  { %2087 = vmatmul.mubr.f32.vlgmr.msra.gmra.mrb[4].mxu0 %v2525_v1 }
 0x21d   :  { %2195 = vmatpush3.bf16.msra.mxu0 %v2194_v30  ;;  %2097 = vmatprep.mubr.msk.f32.mxu0 %vm2312_vm2, %v2313_v49 }
 0x21e   :  { %2196 = vmatprep.subr.bf16.mxu0 %v2311_v48 }
 0x221   :  { %2198 = vmatpush3.bf16.msra.mxu0 %v2197_v42 }
 0x222   :  { %2199 = vmatprep.subr.bf16.mxu0 %v2311_v48 }
 0x224   :  { %2098 = vmatmul.mubr.f32.vlgmr.msra.gmra.mrb[4].mxu0 %v2528_v7 }
 0x225   :  { %2201 = vmatpush3.bf16.msra.mxu0 %v2182_v22  ;;  %2108 = vmatprep.mubr.msk.f32.mxu0 %vm2312_vm2, %v2313_v49 }
 0x226   :  { %2202 = vmatprep.subr.bf16.mxu0 %v2311_v48 }
 0x229   :  { %2204 = vmatpush3.bf16.msra.mxu0 %v2185_v34 }
 0x22a   :  { %2205 = vmatprep.subr.bf16.mxu0 %v2311_v48 }
 0x22c   :  { %2109 = vmatmul.mubr.f32.vlgmr.msra.gmra.mrb[4].mxu0 %v1391_v17 }
 0x22d   :  { %2207 = vmatpush3.bf16.msra.mxu0 %v2206_v36  ;;  %2119 = vmatprep.mubr.msk.f32.mxu0 %vm2312_vm2, %v2313_v49 }
 0x22e   :  { %2208 = vmatprep.subr.bf16.mxu0 %v2311_v48 }
 0x231   :  { %2210 = vmatpush3.bf16.msra.mxu0 %v2209_v46 }
 0x232   :  { %2211 = vmatprep.subr.bf16.mxu0 %v2311_v48 }
 0x234   :  { %2120 = vmatmul.mubr.f32.vlgmr.msra.gmra.mrb[4].mxu0 %v2525_v1 }
 0x235   :  { %2213 = vmatpush3.bf16.msra.mxu0 %v2182_v22  ;;  %2130 = vmatprep.mubr.msk.f32.mxu0 %vm2312_vm2, %v2313_v49 }
 0x236   :  { %2214 = vmatprep.subr.bf16.mxu0 %v2311_v48 }
 0x239   :  { %2216 = vmatpush3.bf16.msra.mxu0 %v2185_v34 }
 0x23c   :  { %2131 = vmatmul.mubr.f32.vlgmr.msra.gmra.mrb[4].mxu0 %v2525_v1 }
 0x2e7   :  { %v1395_v53 = vpop.f32.mrb[8].mxu1 }
 0x2e8   :  { %v2077_v54 = vpop.f32.mrb[9].mxu1  ;;  %v1396_v56 = vadd.f32 %v1395_v53, %v1315_v55 }
 0x30f   :  { %v1801_v57 = vpop.f32.mrb[4].mxu0 }
 0x310   :  { %v2230_v58 = vadd.f32 %v1801_v57, %v1396_v56  ;;  %v2132_v59 = vpop.f32.mrb[5].mxu0 }
 0x312   :  { %v1805_v60 = vsub.f32 0.0, %v2230_v58 }
 0x314   :  { %v1806_v61 = vmul.f32 1.442695, %v1805_v60 }
 0x316   :  { %2282 = vpow2.f32 %v1806_v61 }
 0x320   :  { %v2283_v62 = vpop.eup %2282 }
 0x321   :  { %v1808_v0 = vadd.f32 1.0, %v2283_v62 }
 0x323   :  { %2284 = vrcp.f32 %v1808_v0 }
 0x32d   :  { %v2285_v48 = vpop.eup %2284 }
 0x32e   :  { %1812 = vst.msk [vmem:[#allocation2] sm:$0x3] %vm1811_vm3, %v2285_v48 }
 0x32f   :  { %2297 = shalt.err (!%p2294_p4)
}
 0x330   :  { %s2298_s13 = scalar_lea.hbm %s2573_s7, 32 }
 0x331   :  { %p2299_p5 = scmp.ne.s32.totalorder %s2573_s7, %s2298_s13  ;;  %p2302_p6 = scmp.lt.u32.totalorder %s2298_s13, %s2573_s7 }
 0x333   :  { %p2304_p7 = pnand %p2302_p6, %p2299_p5 }
 0x335   :  { %2307 = shalt.err (!%p2304_p7)
}
 0x336   :  { %1822 = dma.vmem_to_hbm [thread:$0]  %s1820_s9, 32, %s2573_s7, [#allocation3]  }
 0x337   :  { %2308 = dma.done.wait [#allocation3], 32  }
 0x338   :  { %2309 = vsyncadd [#allocation3], 4294967264 }
 0x339   :  { %1826 = vsyncpa [#allocation3], 1 }

</bundles_post_ra>
